<compile_context>
chip_gen: v7x
topology: tpu7x:2x2x1
jax: 0.10.0
libtpu: 0.0.40
codegen_flags: <defaults>
</compile_context>

<pallas_src>
import jax
import jax.numpy as jnp
from jax.experimental import pallas as pl
from jax.experimental.pallas import tpu as pltpu


def _round_up(n, m):
    return ((n + m - 1) // m) * m


def _make_kernel(n_branches):
    """Kernel that runs the shared MLP on `n_branches` input tiles."""

    def kernel(*refs):
        x_refs = refs[:n_branches]
        (w1_ref, b1_ref, w2_ref, b2_ref, w3_ref, b3_ref,
         w4_ref, b4_ref) = refs[n_branches:n_branches + 8]
        o_refs = refs[n_branches + 8:]

        cdt = w1_ref.dtype                       # MXU compute dtype (bf16 default)
        w1, w2, w3, w4 = w1_ref[...], w2_ref[...], w3_ref[...], w4_ref[...]
        b1, b2, b3 = b1_ref[...], b2_ref[...], b3_ref[...]
        b4 = b4_ref[0]                           # scalar bias from SMEM

        for x_ref, o_ref in zip(x_refs, o_refs):
            # In-kernel cast: x arrives f32; MXU operands in compute dtype,
            # accumulation + elementwise in f32 (v5e VPU/EUP have no bf16).
            x = x_ref[...].astype(cdt)
            h = jnp.dot(x, w1, preferred_element_type=jnp.float32) + b1
            h = jnp.maximum(h, 0.0)
            h = jnp.dot(h.astype(cdt), w2, preferred_element_type=jnp.float32) + b2
            h = jnp.maximum(h, 0.0)
            h = jnp.dot(h.astype(cdt), w3, preferred_element_type=jnp.float32) + b3
            h = jnp.maximum(h, 0.0)
            # fc4: contract the (1, H) weight row against h (TB, H) on the feature
            # axis (A @ B^T, same pattern as q @ k^T) -> logits come out as a
            # lane-dense (1, TB) row, ready for unmasked stores. The M=1 MXU pass
            # is negligible next to the three H-wide layers.
            logits = jax.lax.dot_general(
                w4, h.astype(cdt),
                dimension_numbers=(((1,), (1,)), ((), ())),
                preferred_element_type=jnp.float32) + b4
            o_ref[...] = jax.nn.sigmoid(logits).reshape(o_ref.shape).astype(o_ref.dtype)

    return kernel


def _forward(xs, prepared, *, block_rows=512, vmem_limit_bytes=48 * 1024 * 1024):
    """Shared 4-layer MLP + sigmoid over each [B, H] array in `xs`.

    One pallas_call for all branches: weights stay VMEM-resident (single-buffered)
    while the batch axis is pipelined. Returns one [B, 1] f32 array per input.
    """
    w1, b1, w2, b2, w3, b3, w4, b4 = prepared
    n = len(xs)
    B, H = xs[0].shape
    for x in xs:
        assert x.shape == (B, H), "all branches must share the same [B, H] shape"
    assert w1.shape[0] == H

    # Batch tile: multiple of 8 (f32 sublane granularity of the x blocks). For
    # production batches keep block_rows a multiple of 128 so the MXU M dimension
    # has no ragged passes (v5e). 512 default per v6e feedback; re-derive for v7x
    # (64 MiB physical VMEM). No explicit pad: ragged last block + [:B] slice.
    TB = min(block_rows, _round_up(B, 8))
    nb = pl.cdiv(B, TB)

    x_spec = pl.BlockSpec((TB, H), lambda i: (i, 0))

    def resident(arr):
        # Whole array, constant block index -> VMEM-resident across all grid steps;
        # Buffered(1) avoids pointlessly double-buffering the never-changing block.
        shape = arr.shape
        return pl.BlockSpec(shape, lambda i: (0,) * len(shape),
                            pipeline_mode=pl.Buffered(1))

    in_specs = [x_spec] * n + [
        resident(w1), resident(b1),
        resident(w2), resident(b2),
        resident(w3), resident(b3),
        resident(w4),
        pl.BlockSpec(memory_space=pltpu.MemorySpace.SMEM),     # b4 scalar
    ]
    # Lane-dense output slabs: (nb, 1, TB) arrays with (1, 1, TB) blocks. The last
    # two block dims equal the array dims (layout-legal for any TB) and the TB-wide
    # logits row is written with dense lane stores instead of width-1 masked stores.
    out_specs = tuple(pl.BlockSpec((1, 1, TB), lambda i: (i, 0, 0)) for _ in range(n))
    out_shape = tuple(jax.ShapeDtypeStruct((nb, 1, TB), jnp.float32) for _ in range(n))

    outs = pl.pallas_call(
        _make_kernel(n),
        grid=(nb,),
        in_specs=in_specs,
        out_specs=out_specs,
        out_shape=out_shape,
        compiler_params=pltpu.CompilerParams(
            # TODO(synk): verify the batch axis really splits across both v7x
            # TensorCores; if one TC sits idle, switch to pltpu.CORE_PARALLEL
            # (requires nb >= 2).
            dimension_semantics=("parallel",),
            vmem_limit_bytes=vmem_limit_bytes),
    )(*xs, w1, b1, w2, b2, w3, b3, w4, b4)

    # Rows past B in the ragged last block are garbage; drop them here.
    return tuple(o.reshape(-1)[:B].reshape(B, 1) for o in outs)


def pairwise_network(pos_features, neg_features, prepared, **kw):
    """Mirrors PairwiseNetwork.forward: returns (pos_out, neg_out), each [B, 1]."""
    pos_out, neg_out = _forward((pos_features, neg_features), prepared, **kw)
    return pos_out, neg_out


def predict(test_feat, prepared, **kw):
    """Mirrors PairwiseNetwork.predict."""
    (out,) = _forward((test_feat,), prepared, **kw)
    return out


def init_params(key, hidden_size):
    """nn.Linear-shaped params in f32: fc1..fc3 pre-transposed to (in, out),
    biases (1, out); fc4 weight kept as the (1, H) torch row, bias (1,)."""
    H = hidden_size
    params = []
    for d_in, d_out in [(H, 2 * H), (2 * H, H), (H, H)]:
        key, kw_, kb = jax.random.split(key, 3)
        bound = d_in ** -0.5                     # nn.Linear uniform init range
        w = jax.random.uniform(kw_, (d_in, d_out), jnp.float32, -bound, bound)
        b = jax.random.uniform(kb, (1, d_out), jnp.float32, -bound, bound)
        params += [w, b]
    key, kw_, kb = jax.random.split(key, 3)
    bound = H ** -0.5
    w4 = jax.random.uniform(kw_, (1, H), jnp.float32, -bound, bound)
    b4 = jax.random.uniform(kb, (1,), jnp.float32, -bound, bound)
    params += [w4, b4]
    return tuple(params)


def prepare_params(params, compute_dtype=jnp.bfloat16):
    """One-time cast/pack of the parameters for the kernel (call OUTSIDE the hot
    loop): MXU operands in compute_dtype, biases in f32, fc4 bias as (1,) scalar."""
    # TODO(synk): pad hidden dims to multiples of 256 here for v6e/v7x MXU alignment
    # (weights are resident so the one-time pad is free).
    # TODO(synk): generation-gated fp8 (v7x) / int8 (v5e/v6e) resident-weight quant.
    w1, b1, w2, b2, w3, b3, w4, b4 = params
    return (w1.astype(compute_dtype), b1.astype(jnp.float32).reshape(1, -1),
            w2.astype(compute_dtype), b2.astype(jnp.float32).reshape(1, -1),
            w3.astype(compute_dtype), b3.astype(jnp.float32).reshape(1, -1),
            w4.astype(compute_dtype).reshape(1, -1),
            b4.astype(jnp.float32).reshape(1))


def _reference(params, x):
    """Pure-JAX reference (HIGHEST precision so f32 matmuls are true f32)."""
    w1, b1, w2, b2, w3, b3, w4, b4 = params
    hp = jax.lax.Precision.HIGHEST
    h = jax.nn.relu(jnp.dot(x, w1, precision=hp) + b1)
    h = jax.nn.relu(jnp.dot(h, w2, precision=hp) + b2)
    h = jax.nn.relu(jnp.dot(h, w3, precision=hp) + b3)
    logits = jnp.sum(h * w4, axis=-1, keepdims=True) + b4
    return jax.nn.sigmoid(logits)


if __name__ == "__main__":
    key = jax.random.PRNGKey(0)
    hidden_size = 32
    batch = 8

    kp, kn, kparams = jax.random.split(key, 3)
    pos_features = jax.random.normal(kp, (batch, hidden_size), jnp.float32)
    neg_features = jax.random.normal(kn, (batch, hidden_size), jnp.float32)
    params = init_params(kparams, hidden_size)

    ref_pos = _reference(params, pos_features)
    ref_neg = _reference(params, neg_features)

    # f32 compute path: near-exact vs. the reference.
    prep_f32 = prepare_params(params, compute_dtype=jnp.float32)
    pos32, neg32 = pairwise_network(pos_features, neg_features, prep_f32)
    jax.block_until_ready((pos32, neg32))
    assert pos32.shape == (batch, 1) and neg32.shape == (batch, 1)
    assert jnp.allclose(pos32, ref_pos, atol=1e-4, rtol=1e-4)
    assert jnp.allclose(neg32, ref_neg, atol=1e-4, rtol=1e-4)

    # Default bf16 MXU path (f32 accumulation): looser tolerance after sigmoid.
    prep_bf16 = prepare_params(params, compute_dtype=jnp.bfloat16)
    pos_bf, neg_bf = pairwise_network(pos_features, neg_features, prep_bf16)
    jax.block_until_ready((pos_bf, neg_bf))
    assert pos_bf.shape == (batch, 1) and neg_bf.shape == (batch, 1)
    assert jnp.allclose(pos_bf, ref_pos, atol=3e-2, rtol=3e-2)
    assert jnp.allclose(neg_bf, ref_neg, atol=3e-2, rtol=3e-2)

    # predict() path (single branch, same resident-weight kernel).
    test_out = predict(pos_features, prep_f32)
    jax.block_until_ready(test_out)
    assert test_out.shape == (batch, 1)
    assert jnp.allclose(test_out, ref_pos, atol=1e-4, rtol=1e-4)

    print("KERNEL_OK")
</pallas_src>

<mosaic_0001>
module attributes {stable_mosaic.version = 11 : i64} {
  func.func @kernel(%arg0: i32, %arg1: memref<8x32xf32, #tpu.memory_space<vmem>>, %arg2: memref<8x32xf32, #tpu.memory_space<vmem>>, %arg3: memref<32x64xf32, #tpu.memory_space<vmem>>, %arg4: memref<1x64xf32, #tpu.memory_space<vmem>>, %arg5: memref<64x32xf32, #tpu.memory_space<vmem>>, %arg6: memref<1x32xf32, #tpu.memory_space<vmem>>, %arg7: memref<32x32xf32, #tpu.memory_space<vmem>>, %arg8: memref<1x32xf32, #tpu.memory_space<vmem>>, %arg9: memref<1x32xf32, #tpu.memory_space<vmem>>, %arg10: memref<1xf32, #tpu.memory_space<smem>>, %arg11: memref<1x1x8xf32, #tpu.memory_space<vmem>>, %arg12: memref<1x1x8xf32, #tpu.memory_space<vmem>>) attributes {dimension_semantics = [#tpu.dimension_semantics<parallel>], iteration_bounds = array<i64: 1>, scalar_prefetch = 0 : i64, scratch_operands = 0 : i64, tpu.core_type = #tpu.core_type<tc>, window_params = [{transform_indices = @transform_0, window_bounds = array<i64: 8, 32>}, {transform_indices = @transform_1, window_bounds = array<i64: 8, 32>}, {pipeline_mode = #tpu.pipeline_mode<synchronous>, transform_indices = @transform_2, window_bounds = array<i64: 32, 64>}, {pipeline_mode = #tpu.pipeline_mode<synchronous>, transform_indices = @transform_3, window_bounds = array<i64: 1, 64>}, {pipeline_mode = #tpu.pipeline_mode<synchronous>, transform_indices = @transform_4, window_bounds = array<i64: 64, 32>}, {pipeline_mode = #tpu.pipeline_mode<synchronous>, transform_indices = @transform_5, window_bounds = array<i64: 1, 32>}, {pipeline_mode = #tpu.pipeline_mode<synchronous>, transform_indices = @transform_6, window_bounds = array<i64: 32, 32>}, {pipeline_mode = #tpu.pipeline_mode<synchronous>, transform_indices = @transform_7, window_bounds = array<i64: 1, 32>}, {pipeline_mode = #tpu.pipeline_mode<synchronous>, transform_indices = @transform_8, window_bounds = array<i64: 1, 32>}, {transform_indices = @transform_9, window_bounds = array<i64: 1>}, {transform_indices = @transform_10, window_bounds = array<i64: 1, 1, 8>}, {transform_indices = @transform_11, window_bounds = array<i64: 1, 1, 8>}]} {
    %c0 = arith.constant 0 : index
    %c0_0 = arith.constant 0 : index
    %0 = vector.load %arg3[%c0, %c0_0] : memref<32x64xf32, #tpu.memory_space<vmem>>, vector<32x64xf32>
    %c0_1 = arith.constant 0 : index
    %c0_2 = arith.constant 0 : index
    %1 = vector.load %arg5[%c0_1, %c0_2] : memref<64x32xf32, #tpu.memory_space<vmem>>, vector<64x32xf32>
    %c0_3 = arith.constant 0 : index
    %c0_4 = arith.constant 0 : index
    %2 = vector.load %arg7[%c0_3, %c0_4] : memref<32x32xf32, #tpu.memory_space<vmem>>, vector<32x32xf32>
    %c0_5 = arith.constant 0 : index
    %c0_6 = arith.constant 0 : index
    %3 = vector.load %arg9[%c0_5, %c0_6] : memref<1x32xf32, #tpu.memory_space<vmem>>, vector<1x32xf32>
    %c0_7 = arith.constant 0 : index
    %c0_8 = arith.constant 0 : index
    %4 = vector.load %arg4[%c0_7, %c0_8] : memref<1x64xf32, #tpu.memory_space<vmem>>, vector<1x64xf32>
    %c0_9 = arith.constant 0 : index
    %c0_10 = arith.constant 0 : index
    %5 = vector.load %arg6[%c0_9, %c0_10] : memref<1x32xf32, #tpu.memory_space<vmem>>, vector<1x32xf32>
    %c0_11 = arith.constant 0 : index
    %c0_12 = arith.constant 0 : index
    %6 = vector.load %arg8[%c0_11, %c0_12] : memref<1x32xf32, #tpu.memory_space<vmem>>, vector<1x32xf32>
    %c0_13 = arith.constant 0 : index
    %7 = memref.load %arg10[%c0_13] : memref<1xf32, #tpu.memory_space<smem>>
    %c0_14 = arith.constant 0 : index
    %c0_15 = arith.constant 0 : index
    %8 = vector.load %arg1[%c0_14, %c0_15] : memref<8x32xf32, #tpu.memory_space<vmem>>, vector<8x32xf32>
    %cst = arith.constant dense<0.000000e+00> : vector<8x64xf32>
    %9 = tpu.matmul %8, %0, %cst {dimension_numbers = #tpu.dot_dimension_numbers<[1], [0], [0], [1], [0, 0, 1, 1], [], []>} : vector<8x32xf32>, vector<32x64xf32>, vector<8x64xf32> -> vector<8x64xf32>
    %10 = vector.broadcast %4 : vector<1x64xf32> to vector<8x64xf32>
    %11 = arith.addf %9, %10 : vector<8x64xf32>
    %cst_16 = arith.constant 0.000000e+00 : f32
    %12 = vector.broadcast %cst_16 : f32 to vector<8x64xf32>
    %13 = arith.maximumf %11, %12 : vector<8x64xf32>
    %cst_17 = arith.constant dense<0.000000e+00> : vector<8x32xf32>
    %14 = tpu.matmul %13, %1, %cst_17 {dimension_numbers = #tpu.dot_dimension_numbers<[1], [0], [0], [1], [0, 0, 1, 1], [], []>} : vector<8x64xf32>, vector<64x32xf32>, vector<8x32xf32> -> vector<8x32xf32>
    %15 = vector.broadcast %5 : vector<1x32xf32> to vector<8x32xf32>
    %16 = arith.addf %14, %15 : vector<8x32xf32>
    %cst_18 = arith.constant 0.000000e+00 : f32
    %17 = vector.broadcast %cst_18 : f32 to vector<8x32xf32>
    %18 = arith.maximumf %16, %17 : vector<8x32xf32>
    %cst_19 = arith.constant dense<0.000000e+00> : vector<8x32xf32>
    %19 = tpu.matmul %18, %2, %cst_19 {dimension_numbers = #tpu.dot_dimension_numbers<[1], [0], [0], [1], [0, 0, 1, 1], [], []>} : vector<8x32xf32>, vector<32x32xf32>, vector<8x32xf32> -> vector<8x32xf32>
    %20 = vector.broadcast %6 : vector<1x32xf32> to vector<8x32xf32>
    %21 = arith.addf %19, %20 : vector<8x32xf32>
    %cst_20 = arith.constant 0.000000e+00 : f32
    %22 = vector.broadcast %cst_20 : f32 to vector<8x32xf32>
    %23 = arith.maximumf %21, %22 : vector<8x32xf32>
    %cst_21 = arith.constant dense<0.000000e+00> : vector<1x8xf32>
    %24 = tpu.matmul %3, %23, %cst_21 {dimension_numbers = #tpu.dot_dimension_numbers<[1], [1], [0], [0], [0, 0, 1, 0], [], []>} : vector<1x32xf32>, vector<8x32xf32>, vector<1x8xf32> -> vector<1x8xf32>
    %25 = vector.broadcast %7 : f32 to vector<1x8xf32>
    %26 = arith.addf %24, %25 : vector<1x8xf32>
    %27 = arith.negf %26 : vector<1x8xf32>
    %28 = math.exp %27 : vector<1x8xf32>
    %cst_22 = arith.constant 1.000000e+00 : f32
    %29 = vector.broadcast %cst_22 : f32 to vector<1x8xf32>
    %30 = arith.addf %29, %28 : vector<1x8xf32>
    %31 = arith.divf %29, %30 : vector<1x8xf32>
    %32 = vector.shape_cast %31 : vector<1x8xf32> to vector<1x1x8xf32>
    %c0_23 = arith.constant 0 : index
    %c0_24 = arith.constant 0 : index
    %c0_25 = arith.constant 0 : index
    %33 = vector.load %arg11[%c0_23, %c0_24, %c0_25] : memref<1x1x8xf32, #tpu.memory_space<vmem>>, vector<1x1x8xf32>
    tpu.vector_store %arg11[%c0_23, %c0_24, %c0_25], %32 {strides = array<i32>} : memref<1x1x8xf32, #tpu.memory_space<vmem>>, vector<1x1x8xf32>,
    %c0_26 = arith.constant 0 : index
    %c0_27 = arith.constant 0 : index
    %34 = vector.load %arg2[%c0_26, %c0_27] : memref<8x32xf32, #tpu.memory_space<vmem>>, vector<8x32xf32>
    %cst_28 = arith.constant dense<0.000000e+00> : vector<8x64xf32>
    %35 = tpu.matmul %34, %0, %cst_28 {dimension_numbers = #tpu.dot_dimension_numbers<[1], [0], [0], [1], [0, 0, 1, 1], [], []>} : vector<8x32xf32>, vector<32x64xf32>, vector<8x64xf32> -> vector<8x64xf32>
    %36 = vector.broadcast %4 : vector<1x64xf32> to vector<8x64xf32>
    %37 = arith.addf %35, %36 : vector<8x64xf32>
    %cst_29 = arith.constant 0.000000e+00 : f32
    %38 = vector.broadcast %cst_29 : f32 to vector<8x64xf32>
    %39 = arith.maximumf %37, %38 : vector<8x64xf32>
    %cst_30 = arith.constant dense<0.000000e+00> : vector<8x32xf32>
    %40 = tpu.matmul %39, %1, %cst_30 {dimension_numbers = #tpu.dot_dimension_numbers<[1], [0], [0], [1], [0, 0, 1, 1], [], []>} : vector<8x64xf32>, vector<64x32xf32>, vector<8x32xf32> -> vector<8x32xf32>
    %41 = vector.broadcast %5 : vector<1x32xf32> to vector<8x32xf32>
    %42 = arith.addf %40, %41 : vector<8x32xf32>
    %cst_31 = arith.constant 0.000000e+00 : f32
    %43 = vector.broadcast %cst_31 : f32 to vector<8x32xf32>
    %44 = arith.maximumf %42, %43 : vector<8x32xf32>
    %cst_32 = arith.constant dense<0.000000e+00> : vector<8x32xf32>
    %45 = tpu.matmul %44, %2, %cst_32 {dimension_numbers = #tpu.dot_dimension_numbers<[1], [0], [0], [1], [0, 0, 1, 1], [], []>} : vector<8x32xf32>, vector<32x32xf32>, vector<8x32xf32> -> vector<8x32xf32>
    %46 = vector.broadcast %6 : vector<1x32xf32> to vector<8x32xf32>
    %47 = arith.addf %45, %46 : vector<8x32xf32>
    %cst_33 = arith.constant 0.000000e+00 : f32
    %48 = vector.broadcast %cst_33 : f32 to vector<8x32xf32>
    %49 = arith.maximumf %47, %48 : vector<8x32xf32>
    %cst_34 = arith.constant dense<0.000000e+00> : vector<1x8xf32>
    %50 = tpu.matmul %3, %49, %cst_34 {dimension_numbers = #tpu.dot_dimension_numbers<[1], [1], [0], [0], [0, 0, 1, 0], [], []>} : vector<1x32xf32>, vector<8x32xf32>, vector<1x8xf32> -> vector<1x8xf32>
    %51 = vector.broadcast %7 : f32 to vector<1x8xf32>
    %52 = arith.addf %50, %51 : vector<1x8xf32>
    %53 = arith.negf %52 : vector<1x8xf32>
    %54 = math.exp %53 : vector<1x8xf32>
    %cst_35 = arith.constant 1.000000e+00 : f32
    %55 = vector.broadcast %cst_35 : f32 to vector<1x8xf32>
    %56 = arith.addf %55, %54 : vector<1x8xf32>
    %57 = arith.divf %55, %56 : vector<1x8xf32>
    %58 = vector.shape_cast %57 : vector<1x8xf32> to vector<1x1x8xf32>
    %c0_36 = arith.constant 0 : index
    %c0_37 = arith.constant 0 : index
    %c0_38 = arith.constant 0 : index
    %59 = vector.load %arg12[%c0_36, %c0_37, %c0_38] : memref<1x1x8xf32, #tpu.memory_space<vmem>>, vector<1x1x8xf32>
    tpu.vector_store %arg12[%c0_36, %c0_37, %c0_38], %58 {strides = array<i32>} : memref<1x1x8xf32, #tpu.memory_space<vmem>>, vector<1x1x8xf32>,
    return
  }
  func.func @transform_0(%arg0: i32) -> (i32, i32) {
    %c0_i32 = arith.constant 0 : i32
    %c0_i32_0 = arith.constant 0 : i32
    return %arg0, %c0_i32 : i32, i32
  }
  func.func @transform_1(%arg0: i32) -> (i32, i32) {
    %c0_i32 = arith.constant 0 : i32
    %c0_i32_0 = arith.constant 0 : i32
    return %arg0, %c0_i32 : i32, i32
  }
  func.func @transform_2(%arg0: i32) -> (i32, i32) {
    %c0_i32 = arith.constant 0 : i32
    %c0_i32_0 = arith.constant 0 : i32
    %c0_i32_1 = arith.constant 0 : i32
    return %c0_i32, %c0_i32_0 : i32, i32
  }
  func.func @transform_3(%arg0: i32) -> (i32, i32) {
    %c0_i32 = arith.constant 0 : i32
    %c0_i32_0 = arith.constant 0 : i32
    %c0_i32_1 = arith.constant 0 : i32
    return %c0_i32, %c0_i32_0 : i32, i32
  }
  func.func @transform_4(%arg0: i32) -> (i32, i32) {
    %c0_i32 = arith.constant 0 : i32
    %c0_i32_0 = arith.constant 0 : i32
    %c0_i32_1 = arith.constant 0 : i32
    return %c0_i32, %c0_i32_0 : i32, i32
  }
  func.func @transform_5(%arg0: i32) -> (i32, i32) {
    %c0_i32 = arith.constant 0 : i32
    %c0_i32_0 = arith.constant 0 : i32
    %c0_i32_1 = arith.constant 0 : i32
    return %c0_i32, %c0_i32_0 : i32, i32
  }
  func.func @transform_6(%arg0: i32) -> (i32, i32) {
    %c0_i32 = arith.constant 0 : i32
    %c0_i32_0 = arith.constant 0 : i32
    %c0_i32_1 = arith.constant 0 : i32
    return %c0_i32, %c0_i32_0 : i32, i32
  }
  func.func @transform_7(%arg0: i32) -> (i32, i32) {
    %c0_i32 = arith.constant 0 : i32
    %c0_i32_0 = arith.constant 0 : i32
    %c0_i32_1 = arith.constant 0 : i32
    return %c0_i32, %c0_i32_0 : i32, i32
  }
  func.func @transform_8(%arg0: i32) -> (i32, i32) {
    %c0_i32 = arith.constant 0 : i32
    %c0_i32_0 = arith.constant 0 : i32
    %c0_i32_1 = arith.constant 0 : i32
    return %c0_i32, %c0_i32_0 : i32, i32
  }
  func.func @transform_9(%arg0: i32) -> i32 {
    %c0_i32 = arith.constant 0 : i32
    %c0_i32_0 = arith.constant 0 : i32
    return %c0_i32 : i32
  }
  func.func @transform_10(%arg0: i32) -> (i32, i32, i32) {
    %c0_i32 = arith.constant 0 : i32
    %c0_i32_0 = arith.constant 0 : i32
    %c0_i32_1 = arith.constant 0 : i32
    return %arg0, %c0_i32, %c0_i32_0 : i32, i32, i32
  }
  func.func @transform_11(%arg0: i32) -> (i32, i32, i32) {
    %c0_i32 = arith.constant 0 : i32
    %c0_i32_0 = arith.constant 0 : i32
    %c0_i32_1 = arith.constant 0 : i32
    return %arg0, %c0_i32, %c0_i32_0 : i32, i32, i32
  }
}

</mosaic_0001>

<bundles_post_ra>
// kernel: tpu_custom_call.1
= control target key start
LH: loop header
LB: loop body
LE: loop exit
PB: predicated region body
PF: predicated region fallthrough
CT: control target
= control target key end

     0   :  { %18 = vsyncpa [#allocation4], 0  ;;  %v978_v3 = vmov 0.0|0.0   ;;  %vm979_vm0 = vmmov 0   ;;  %v980_v6 = vmov 0.0   ;;  %s1194_s0 = inlined_call_operand.vmem [shape: f32[8,32], index: 0, kind: input, shape index: {}]   ;;  %s1195_s1 = inlined_call_operand.vmem [shape: f32[8,32], index: 1, kind: input, shape index: {}]   ;;  %s1196_s2 = inlined_call_operand.vmem [shape: f32[32,64], index: 2, kind: input, shape index: {}]   ;;  %s1197_s3 = inlined_call_operand.vmem [shape: f32[1,64], index: 3, kind: input, shape index: {}]   ;;  %s1198_s4 = inlined_call_operand.vmem [shape: f32[64,32], index: 4, kind: input, shape index: {}]   ;;  %s1199_s5 = inlined_call_operand.vmem [shape: f32[1,32], index: 5, kind: input, shape index: {}]   ;;  %s1200_s6 = inlined_call_operand.vmem [shape: f32[32,32], index: 6, kind: input, shape index: {}]   ;;  %s1201_s7 = inlined_call_operand.vmem [shape: f32[1,32], index: 7, kind: input, shape index: {}]   ;;  %s1202_s8 = inlined_call_operand.vmem [shape: f32[1,32], index: 8, kind: input, shape index: {}]   ;;  %s1203_s9 = inlined_call_operand.<no memory space> [shape: f32[1], index: 9, kind: input, shape index: {}]   ;;  %s1204_s10 = inlined_call_operand.hbm [shape: f32[1,1,8], index: 10, kind: output, shape index: {0}]   ;;  %s1205_s11 = inlined_call_operand.hbm [shape: f32[1,1,8], index: 11, kind: output, shape index: {1}]  }
   0x1   :  { %v40_v0 = vld [vmem:[%s1196_s2] sm:$0xff]  ;;  %v41_v1 = vld [vmem:[%s1196_s2 + $0x8] sm:$0xff]  ;;  %v42_v2 = vld [vmem:[%s1196_s2 + $0x10] sm:$0xff]  ;;  %869 = vmatprep.subr.bf16.mxu0 %v978_v3  ;;  %785 = vmatprep.mubr.msk.f32.mxu0 %vm979_vm0, %v980_v6 }
   0x2   :  { %v870_v4 = vpack.c.bf16 %v41_v1, %v40_v0  ;;  %v43_v5 = vld [vmem:[%s1196_s2 + $0x18] sm:$0xff]  ;;  %v44_v7 = vld [vmem:[%s1198_s4] sm:$0xff]  ;;  %875 = vmatprep.subr.bf16.mxu1 %v978_v3  ;;  %v45_v8 = vld [vmem:[%s1198_s4 + $0x8] sm:$0xff]  ;;  %804 = vmatprep.mubr.msk.f32.mxu1 %vm979_vm0, %v980_v6 }
   0x3   :  { %v46_v9 = vld [vmem:[%s1198_s4 + $0x10] sm:$0xff]  ;;  %v47_v10 = vld [vmem:[%s1198_s4 + $0x18] sm:$0xff]  ;;  %v873_v11 = vpack.c.bf16 %v43_v5, %v42_v2  ;;  %v1073_v12 = vpack.c.bf16 %v45_v8, %v44_v7 }
   0x4   :  { %871 = vmatpush3.bf16.msra.mxu0 %v870_v4 }
   0x5   :  { %872 = vmatprep.subr.bf16.mxu0 %v978_v3 }
   0x6   :  { %19 = vsyncpa [#allocation6], 0  ;;  %877 = vmatpush3.bf16.msra.mxu1 %v1073_v12  ;;  %v1077_v13 = vpack.c.bf16 %v47_v10, %v46_v9  ;;  %v48_v14 = vld [vmem:[%s1198_s4 + $0x20] sm:$0xff]  ;;  %v49_v15 = vld [vmem:[%s1198_s4 + $0x28] sm:$0xff]  ;;  %vm68_vm1 = vcmask 261120   ;;  %vm149_vm2 = vcmask 523264   ;;  %v304_v48 = vstv %s1203_s9 }
   0x7   :  { %878 = vmatprep.subr.bf16.mxu1 %v978_v3  ;;  %v61_v16 = vld [vmem:[%s1194_s0] sm:$0xff]  ;;  %v1091_v17 = vpack.c.bf16 %v49_v15, %v48_v14  ;;  %v50_v18 = vld [vmem:[%s1198_s4 + $0x30] sm:$0xff]  ;;  %v51_v19 = vld [vmem:[%s1198_s4 + $0x38] sm:$0xff]  ;;  %vm387_vm3 = vcmask 57344   ;;  %s981_s9 = smov [#allocation3]  }
   0x8   :  { %874 = vmatpush3.bf16.msra.mxu0 %v873_v11  ;;  %v885_v20 = vpack.c.bf16 %v51_v19, %v50_v18  ;;  %v52_v21 = vld [vmem:[%s1200_s6] sm:$0xff]  ;;  %v53_v22 = vld [vmem:[%s1200_s6 + $0x8] sm:$0xff]  ;;  %v54_v29 = vld [vmem:[%s1200_s6 + $0x10] sm:$0xff]  ;;  %s698_s15 = sshll.u32 %s981_s9, 4  ;;  %s699_s15 = int_to_ptr.vmem [resolvable:$true] %s698_s15 }
   0x9   :  { %887 = vmatprep.subr.bf16.mxu0 %v978_v3  ;;  %v888_v23 = vpack.c.bf16 %v53_v22, %v52_v21  ;;  %v720_v24 = vld [vmem:[%s1197_s3] ss:$0 sm:$0xff]  ;;  %v55_v30 = vld [vmem:[%s1200_s6 + $0x18] sm:$0xff]  ;;  %s930_s16 = scalar_lea.vmem %s699_s15, 16  ;;  %s934_s17 = scalar_lea.vmem %s699_s15, 32 }
   0xa   :  { %880 = vmatpush3.bf16.msra.mxu1 %v1077_v13  ;;  %v891_v31 = vpack.c.bf16 %v55_v30, %v54_v29  ;;  %v389_v32 = vld [vmem:[%s1195_s1] sm:$0xff]  ;;  %p931_p0 = scmp.ne.s32.totalorder %s699_s15, %s930_s16  ;;  %p935_p1 = scmp.lt.s32.totalorder %s699_s15, %s699_s15 }
   0xb   :  { %786 = vmatmul.mubr.msk.f32.vlgmr.msra.gmra.mrb[0].mxu0 %vm68_vm1, %v61_v16  ;;  %881 = vmatprep.subr.bf16.mxu1 %v978_v3  ;;  %v722_v33 = vld [vmem:[%s1199_s5] ss:$0 sm:$0xff]  ;;  %p936_p2 = scmp.lt.s32.totalorder %s934_s17, %s930_s16 }
   0xc   :  { %815 = vmatprep.mubr.msk.f32.mxu0 %vm979_vm0, %v980_v6  ;;  %889 = vmatpush3.bf16.msra.mxu0 %v888_v23  ;;  %v724_v40 = vld [vmem:[%s1201_s7] ss:$0 sm:$0xff] }
   0xd   :  { %890 = vmatprep.subr.bf16.mxu0 %v978_v3  ;;  %v56_v45 = vld [vmem:[%s1202_s8] sm:$0x1]  ;;  %p937_p3 = por %p936_p2, %p935_p1 }
   0xe   :  { %883 = vmatpush3.bf16.msra.mxu1 %v1091_v17 }
   0xf   :  { %884 = vmatprep.subr.bf16.mxu1 %v978_v3  ;;  %p938_p4 = pnand %p937_p3, %p931_p0 }
  0x10   :  { %892 = vmatpush3.bf16.msra.mxu0 %v891_v31 }
  0x11   :  { %818 = vmatprep.subr.mxu0 %v980_v6 }
  0x12   :  { %886 = vmatpush3.bf16.msra.mxu1 %v885_v20 }
  0x13   :  { %893 = vmatprep.subr.bf16.mxu1 %v978_v3 }
  0xde   :  { %v138_v25 = vpop.f32.mrb[0].mxu0 }
  0xdf   :  { %v139_v26 = vadd.f32 %v720_v24, %v138_v25  ;;  %v787_v27 = vpop.f32.mrb[1].mxu0 }
  0xe1   :  { %v142_v28 = vmax.f32 %v139_v26, 0.0 }
  0xe3   :  { %805 = vmatmul.mubr.msk.f32.vlgmr.msra.gmra.mrb[0].mxu1 %vm149_vm2, %v142_v28 }
  0xe4   :  { %895 = vmatpush3.bf16.msra.mxu1 %v870_v4  ;;  %831 = vmatprep.mubr.msk.f32.mxu1 %vm979_vm0, %v980_v6 }
  0xe5   :  { %896 = vmatprep.subr.bf16.mxu1 %v978_v3 }
  0xe8   :  { %898 = vmatpush3.bf16.msra.mxu1 %v873_v11 }
  0xe9   :  { %911 = vmatprep.subr.bf16.mxu1 %v978_v3 }
  0xeb   :  { %832 = vmatmul.mubr.msk.f32.vlgmr.msra.gmra.mrb[2].mxu1 %vm68_vm1, %v389_v32 }
  0xec   :  { %913 = vmatpush3.bf16.msra.mxu1 %v888_v23  ;;  %861 = vmatprep.mubr.msk.f32.mxu1 %vm979_vm0, %v980_v6 }
  0xed   :  { %914 = vmatprep.subr.bf16.mxu1 %v978_v3 }
  0xf0   :  { %916 = vmatpush3.bf16.msra.mxu1 %v891_v31 }
  0xf1   :  { %864 = vmatprep.subr.mxu1 %v980_v6 }
 0x1b6   :  { %v219_v34 = vpop.f32.mrb[0].mxu1 }
 0x1b7   :  { %v220_v35 = vadd.f32 %v722_v33, %v219_v34  ;;  %v806_v36 = vpop.f32.mrb[1].mxu1 }
 0x1b9   :  { %v223_v37 = vmax.f32 %v220_v35, 0.0 }
 0x1bb   :  { %816 = vmatmul.mubr.msk.f32.vlgmr.msra.gmra.mrb[2].mxu0 %vm68_vm1, %v223_v37 }
 0x1bc   :  { %820 = vmatprep.mubr.msk.f32.mxu0 %vm979_vm0, %v980_v6 }
 0x1be   :  { %v459_v38 = vpop.f32.mrb[2].mxu1 }
 0x1bf   :  { %v833_v39 = vpop.f32.mrb[3].mxu1  ;;  %v460_v46 = vadd.f32 %v720_v24, %v459_v38 }
 0x1c1   :  { %v463_v47 = vmax.f32 %v460_v46, 0.0 }
 0x28e   :  { %v299_v41 = vpop.f32.mrb[2].mxu0 }
 0x28f   :  { %v300_v42 = vadd.f32 %v724_v40, %v299_v41  ;;  %v817_v43 = vpop.f32.mrb[3].mxu0 }
 0x291   :  { %v303_v44 = vmax.f32 %v300_v42, 0.0 }
 0x293   :  { %819 = vmatpush3.xpose.msk.msra.mxu0 %vm68_vm1, %v303_v44 }
 0x294   :  { %899 = vmatprep.subr.bf16.mxu0 %v978_v3 }
 0x296   :  { %821 = vmatmul.mubr.msk.f32.vlgmr.msra.gmra.mrb[4].mxu0 %vm68_vm1, %v56_v45 }
 0x297   :  { %901 = vmatpush3.bf16.msra.mxu0 %v1073_v12  ;;  %850 = vmatprep.mubr.msk.f32.mxu0 %vm979_vm0, %v980_v6 }
 0x298   :  { %902 = vmatprep.subr.bf16.mxu0 %v978_v3 }
 0x29b   :  { %904 = vmatpush3.bf16.msra.mxu0 %v1077_v13 }
 0x29c   :  { %905 = vmatprep.subr.bf16.mxu0 %v978_v3 }
 0x29f   :  { %907 = vmatpush3.bf16.msra.mxu0 %v1091_v17 }
 0x2a0   :  { %908 = vmatprep.subr.bf16.mxu0 %v978_v3 }
 0x2a3   :  { %910 = vmatpush3.bf16.msra.mxu0 %v885_v20 }
 0x2a6   :  { %851 = vmatmul.mubr.msk.f32.vlgmr.msra.gmra.mrb[6].mxu0 %vm149_vm2, %v463_v47 }
 0x369   :  { %v377_v49 = vpop.f32.mrb[4].mxu0 }
 0x36a   :  { %v378_v50 = vadd.f32 %v377_v49, %v304_v48  ;;  %v822_v51 = vpop.f32.mrb[5].mxu0 }
 0x36c   :  { %v728_v52 = vmul.f32 -1.442695, %v378_v50 }
 0x36e   :  { %922 = vpow2.f32 %v728_v52 }
 0x378   :  { %v923_v53 = vpop.eup %922 }
 0x379   :  { %v384_v54 = vadd.f32 1.0, %v923_v53  ;;  %v533_v55 = vpop.f32.mrb[6].mxu0 }
 0x37a   :  { %v534_v56 = vadd.f32 %v722_v33, %v533_v55  ;;  %v852_v57 = vpop.f32.mrb[7].mxu0 }
 0x37b   :  { %924 = vrcp.f32 %v384_v54 }
 0x37c   :  { %v537_v58 = vmax.f32 %v534_v56, 0.0 }
 0x37e   :  { %862 = vmatmul.mubr.msk.f32.vlgmr.msra.gmra.mrb[4].mxu1 %vm68_vm1, %v537_v58 }
 0x37f   :  { %866 = vmatprep.mubr.msk.f32.mxu1 %vm979_vm0, %v980_v6 }
 0x385   :  { %v925_v59 = vpop.eup %924 }
 0x386   :  { %388 = vst.msk [vmem:[#allocation3] sm:$0x1] %vm387_vm3, %v925_v59 }
 0x451   :  { %v607_v60 = vpop.f32.mrb[4].mxu1 }
 0x452   :  { %v608_v61 = vadd.f32 %v724_v40, %v607_v60  ;;  %v863_v62 = vpop.f32.mrb[5].mxu1 }
 0x454   :  { %v611_v63 = vmax.f32 %v608_v61, 0.0 }
 0x456   :  { %865 = vmatpush3.xpose.msk.msra.mxu1 %vm68_vm1, %v611_v63 }
 0x459   :  { %867 = vmatmul.mubr.msk.f32.vlgmr.msra.gmra.mrb[6].mxu1 %vm68_vm1, %v56_v45 }
 0x45a   :  { %941 = shalt.err (!%p938_p4)
}
 0x45b   :  { %s942_s0 = scalar_lea.hbm %s1204_s10, 16 }
 0x45c   :  { %p943_p5 = scmp.ne.s32.totalorder %s1204_s10, %s942_s0  ;;  %p946_p6 = scmp.lt.u32.totalorder %s942_s0, %s1204_s10 }
 0x45e   :  { %p948_p7 = pnand %p946_p6, %p943_p5 }
 0x460   :  { %951 = shalt.err (!%p948_p7)
}
 0x461   :  { %701 = dma.vmem_to_hbm [thread:$0]  %s699_s15, 16, %s1204_s10, [#allocation4]  }
 0x462   :  { %s982_s26 = smov [#allocation5]  }
 0x463   :  { %s708_s27 = sshll.u32 %s982_s26, 4  ;;  %s709_s27 = int_to_ptr.vmem [resolvable:$true] %s708_s27 }
 0x464   :  { %s952_s4 = scalar_lea.vmem %s709_s27, 16  ;;  %s956_s28 = scalar_lea.vmem %s709_s27, 32 }
 0x465   :  { %p953_p8 = scmp.ne.s32.totalorder %s709_s27, %s952_s4  ;;  %p957_p9 = scmp.lt.s32.totalorder %s709_s27, %s709_s27 }
 0x466   :  { %p958_p10 = scmp.lt.s32.totalorder %s956_s28, %s952_s4 }
 0x468   :  { %p959_p11 = por %p958_p10, %p957_p9 }
 0x46a   :  { %p960_p12 = pnand %p959_p11, %p953_p8 }
 0x52c   :  { %v681_v0 = vpop.f32.mrb[6].mxu1 }
 0x52d   :  { %v682_v1 = vadd.f32 %v681_v0, %v304_v48  ;;  %v868_v2 = vpop.f32.mrb[7].mxu1 }
 0x52f   :  { %v734_v3 = vmul.f32 -1.442695, %v682_v1 }
 0x531   :  { %926 = vpow2.f32 %v734_v3 }
 0x53b   :  { %v927_v4 = vpop.eup %926 }
 0x53c   :  { %v688_v5 = vadd.f32 1.0, %v927_v4 }
 0x53e   :  { %928 = vrcp.f32 %v688_v5 }
 0x548   :  { %v929_v6 = vpop.eup %928 }
 0x549   :  { %691 = vst.msk [vmem:[#allocation5] sm:$0x1] %vm387_vm3, %v929_v6 }
 0x54a   :  { %963 = shalt.err (!%p960_p12)
}
 0x54b   :  { %s964_s29 = scalar_lea.hbm %s1205_s11, 16 }
 0x54c   :  { %p965_p13 = scmp.ne.s32.totalorder %s1205_s11, %s964_s29  ;;  %p968_p0 = scmp.lt.u32.totalorder %s964_s29, %s1205_s11 }
 0x54e   :  { %p970_p1 = pnand %p968_p0, %p965_p13 }
 0x550   :  { %973 = shalt.err (!%p970_p1)
}
 0x551   :  { %711 = dma.vmem_to_hbm [thread:$0]  %s709_s27, 16, %s1205_s11, [#allocation6]  }
 0x552   :  { %974 = dma.done.wait [#allocation4], 16  }
 0x553   :  { %975 = vsyncadd [#allocation4], 4294967280 }
 0x554   :  { %976 = dma.done.wait [#allocation6], 16  }
 0x555   :  { %977 = vsyncadd [#allocation6], 4294967280 }
 0x556   :  { %718 = vsyncpa [#allocation4], 1 }
 0x557   :  { %719 = vsyncpa [#allocation6], 1 }

</bundles_post_ra>
